<compile_context>
chip_gen: v7x
topology: tpu7x:2x2x1
jax: 0.10.0
libtpu: 0.0.40
codegen_flags: <defaults>
</compile_context>

<pallas_src>
from typing import Optional, Tuple

import jax
import jax.numpy as jnp
from jax.experimental import pallas as pl
from jax.experimental.pallas import tpu as pltpu


# ----------------------------------------------------------------------------
# Fused kernel: root resolve + SPU relaxation epilogue.
#   Per grid step i (tile of tn output neurons):
#     cr_ref  : (2, D)   row 0 = box centre, row 1 = box radius
#     wl_ref  : (tn, D)  lower inequality weights (original torch layout)
#     wu_ref  : (tn, D)  upper inequality weights
#     p_ref   : (5, tn)  packed [biasl, biasu, sigmoid(p_uul0),
#                                sigmoid(p_llg0), sigmoid(p_cb)]
#     out_ref : (6, tn)  packed [lb, ub, ineql, biasl, inequ, biasu]
# ----------------------------------------------------------------------------
def _fused_dp_spu_kernel(cr_ref, wl_ref, wu_ref, p_ref, out_ref):
    c = cr_ref[0:1, :]                      # (1, D) box centre
    r = cr_ref[1:2, :]                      # (1, D) box radius (>= 0)

    wl = wl_ref[...]                        # (tn, D)
    wu = wu_ref[...]                        # (tn, D)
    awl = jnp.abs(wl)                       # |W| instead of pos/neg where-splits
    awu = jnp.abs(wu)

    # Contract the last dims of both operands: (1, D) x (tn, D) -> (1, tn).
    # Same dimension numbers as q @ k^T in the flash-attention kernel, so the
    # (tn, D) block is consumed by the MXU with no in-kernel transpose.
    nt_dims = (((1,), (1,)), ((), ()))

    def gemv_t(vec, mat):
        return jax.lax.dot_general(vec, mat, nt_dims,
                                   preferred_element_type=jnp.float32)

    bl = p_ref[0:1, :]
    bu = p_ref[1:2, :]
    su = p_ref[2:3, :]                      # sigmoid(p_uul0), precomputed
    sl = p_ref[3:4, :]                      # sigmoid(p_llg0), precomputed
    sc = p_ref[4:5, :]                      # sigmoid(p_cb),   precomputed

    # rlb@W+ + rub@W-  ==  c@W - r@|W|   (and dually for the upper bound).
    lb = gemv_t(c, wl) - gemv_t(r, awl) + bl
    ub = gemv_t(c, wu) + gemv_t(r, awu) + bu

    # ---- fused SPU relaxation epilogue (DP_SPU.compute_bounds) -------------
    # spu(x) = x^2 - 0.5 (x >= 0) ; sigmoid(-x) - 1 (x < 0)
    def spu_all(x):
        sig = jax.nn.sigmoid(-x)                        # one transcendental / x
        val = jnp.where(x >= 0.0, x * x - 0.5, sig - 1.0)
        slope = jnp.where(x < 0.0, -sig * (1.0 - sig), 2.0 * x)
        icpt = val - slope * x
        return val, slope, icpt

    spu_lb, slope_lb, icpt_lb = spu_all(lb)
    spu_ub, _, _ = spu_all(ub)
    width = ub - lb

    pub = su * width + lb                               # "pubelow"
    pla = sl * width + lb                               # "plabove"
    _, slope_pub, icpt_pub = spu_all(pub)
    _, slope_pla, icpt_pla = spu_all(pla)

    # Exact divides (NOT approx reciprocal): these define the sound relaxation.
    lu_slope = (spu_ub - spu_lb) / (width + 1e-6)
    lu_icpt = spu_ub - lu_slope * ub

    # defaults
    inequ = jnp.zeros_like(lb)
    biasu = jnp.full_like(lb, -0.5)
    ineql = jnp.zeros_like(lb)
    biasl = jnp.maximum(spu_lb, spu_ub)

    # case 1: strictly negative inputs (ub < 0)
    below = ub < 0.0
    inequ = jnp.where(below, slope_pub, inequ)
    biasu = jnp.where(below, icpt_pub, biasu)
    ineql = jnp.where(below, lu_slope, ineql)
    biasl = jnp.where(below, lu_icpt, biasl)

    # case 2: strictly positive inputs (lb > 0)
    above = lb > 0.0
    inequ = jnp.where(above, lu_slope, inequ)
    biasu = jnp.where(above, lu_icpt, biasu)
    ineql = jnp.where(above, slope_pla, ineql)
    biasl = jnp.where(above, icpt_pla, biasl)

    # case 3: crossing zero
    crossing = jnp.logical_and(jnp.logical_not(below), jnp.logical_not(above))
    chord = (spu_lb + 0.5) / (lb + 1e-6)
    slopecb = sc * (jnp.maximum(slope_pub, 0.0) - chord) + chord
    inequ = jnp.where(crossing, lu_slope, inequ)
    biasu = jnp.where(crossing, lu_icpt, biasu)
    ineql = jnp.where(crossing, slopecb, ineql)
    biasl = jnp.where(crossing,
                      jnp.where(slopecb < 0.0,
                                jnp.full_like(lb, -0.5),
                                -slopecb * slopecb * 0.25 - 0.5),
                      biasl)

    # "valley" refinement of the upper bound (tangent at lb) for crossing ones
    crossing_valley = jnp.logical_and(crossing, slope_lb > lu_slope)
    inequ = jnp.where(crossing_valley, slope_lb, inequ)
    biasu = jnp.where(crossing_valley, icpt_lb, biasu)

    # Packed (6, tn) output block -> single output DMA per grid step.
    out_ref[0:1, :] = lb
    out_ref[1:2, :] = ub
    out_ref[2:3, :] = ineql
    out_ref[3:4, :] = biasl
    out_ref[4:5, :] = inequ
    out_ref[5:6, :] = biasu


# ----------------------------------------------------------------------------
# Tile sizing: D- and VMEM-aware, always a multiple of 128.
# ----------------------------------------------------------------------------
def _choose_tile_n(n: int, d: int, *, vmem_budget: int = 24 << 20,
                   max_tile: int = 2048, min_grid_steps: int = 8) -> int:
    """Pick the output-tile width tn (multiple of 128).

    Per step the kernel holds ~24*D bytes per output column in VMEM
    (2 W tiles x 2 pipeline buffers x 4B  +  2 |W| temporaries x 4B), plus a
    few packed per-N vectors -- size tn from that budget so double-buffering
    survives on v7x's 64 MiB VMEM while v5e/v6e still get 1-2k wide tiles.
    Also keep >= min_grid_steps tiles when possible so the "parallel" grid
    axis can feed both v7x TensorCores and keep the DMA pipeline busy.
    """
    n_pad128 = ((max(n, 1) + 127) // 128) * 128
    per_col = 24 * max(d, 1) + 64
    tn = vmem_budget // per_col
    tn = max(128, min(max_tile, (tn // 128) * 128))
    if n_pad128 // tn < min_grid_steps:
        tn = max(128, ((n_pad128 // min_grid_steps) // 128) * 128)
    return min(tn, n_pad128)


# ----------------------------------------------------------------------------
# Wrapper: fused DeepPoly root resolve + SPU relaxation.
# ----------------------------------------------------------------------------
def dp_spu_fused(root_lb, root_ub, ineql, biasl, inequ, biasu,
                 p_uul0, p_llg0, p_cb):
    """ineql/inequ are torch.nn.Linear-style [N, D]; biases [1, N]; root
    bounds [1, D]; SPU parameters [N].  Returns (lb, ub, ineql_vec, biasl,
    inequ_vec, biasu), all [1, N]; ineql_vec/inequ_vec are the diagonals of
    the SPU transform (no dense NxN diag materialization)."""
    n, d = ineql.shape

    # --- wrapper-side prep (all O(N) / O(D); no W copies) --------------------
    rlb = jnp.asarray(root_lb, jnp.float32).reshape(1, d)
    rub = jnp.asarray(root_ub, jnp.float32).reshape(1, d)
    cr = jnp.concatenate([0.5 * (rlb + rub), 0.5 * (rub - rlb)], axis=0)  # (2,D)

    bl = jnp.asarray(biasl, jnp.float32).reshape(1, n)
    bu = jnp.asarray(biasu, jnp.float32).reshape(1, n)
    su = jax.nn.sigmoid(jnp.asarray(p_uul0, jnp.float32)).reshape(1, n)
    sl = jax.nn.sigmoid(jnp.asarray(p_llg0, jnp.float32)).reshape(1, n)
    sc = jax.nn.sigmoid(jnp.asarray(p_cb, jnp.float32)).reshape(1, n)
    params = jnp.concatenate([bl, bu, su, sl, sc], axis=0)               # (5,N)

    wl = jnp.asarray(ineql, jnp.float32)                                 # (N,D)
    wu = jnp.asarray(inequ, jnp.float32)                                 # (N,D)

    tn = _choose_tile_n(n, d)
    n_pad = ((n + tn - 1) // tn) * tn
    pad = n_pad - n
    if pad:
        # Zero-padded neurons resolve to lb=ub=0 and are sliced away below.
        wl = jnp.pad(wl, ((0, pad), (0, 0)))
        wu = jnp.pad(wu, ((0, pad), (0, 0)))
        params = jnp.pad(params, ((0, 0), (0, pad)))

    grid = (n_pad // tn,)
    grid_spec = pltpu.PrefetchScalarGridSpec(
        num_scalar_prefetch=0,
        grid=grid,
        in_specs=[
            pl.BlockSpec((2, d), lambda i: (0, 0)),     # centre / radius
            pl.BlockSpec((tn, d), lambda i: (i, 0)),    # Wl row block (contig)
            pl.BlockSpec((tn, d), lambda i: (i, 0)),    # Wu row block (contig)
            pl.BlockSpec((5, tn), lambda i: (0, i)),    # packed per-N params
        ],
        out_specs=pl.BlockSpec((6, tn), lambda i: (0, i)),
    )

    out = pl.pallas_call(
        _fused_dp_spu_kernel,
        out_shape=jax.ShapeDtypeStruct((6, n_pad), jnp.float32),
        grid_spec=grid_spec,
        compiler_params=pltpu.CompilerParams(
            dimension_semantics=("parallel",),          # shards N over v7x's 2 TCs
            vmem_limit_bytes=48 * 1024 * 1024),
    )(cr, wl, wu, params)

    out = out[:, :n]
    lb, ub = out[0:1, :], out[1:2, :]
    il, blo = out[2:3, :], out[3:4, :]
    iu, buo = out[4:5, :], out[5:6, :]
    return lb, ub, il, blo, iu, buo


# ----------------------------------------------------------------------------
# Minimal DP_Shape analogue (JAX arrays instead of torch tensors)
# ----------------------------------------------------------------------------
class DPShape:
    def __init__(self, lbounds=None, ubounds=None):
        self.parent: Optional["DPShape"] = None
        self._lbounds = lbounds
        self._ubounds = ubounds
        self.transform: Optional[Tuple] = None
        self.diag_transform = False
        if lbounds is not None and ubounds is not None:
            assert lbounds.shape == ubounds.shape
            assert bool(jnp.all(lbounds <= ubounds)), "Invalid bounding boxes."

    @classmethod
    def from_transform(cls, parent, ineql, biasl, inequ, biasu, *, diag=False):
        self = cls.__new__(cls)
        self.parent = parent
        self._lbounds = None
        self._ubounds = None
        self.transform = (ineql, biasl, inequ, biasu)
        self.diag_transform = diag
        return self

    @classmethod
    def from_eps(cls, inputs, eps, clamp):
        lo, hi = clamp
        return cls(jnp.clip(inputs - eps, lo, hi), jnp.clip(inputs + eps, lo, hi))

    @property
    def lbounds(self):
        assert self._lbounds is not None, "call backsub/forward first"
        return self._lbounds

    @property
    def ubounds(self):
        assert self._ubounds is not None, "call backsub/forward first"
        return self._ubounds

    def dense_transform(self):
        """Materialize dense NxN diag matrices on demand (O(N^2); avoid when
        the consumer can apply the diagonal as a row scale)."""
        if self.transform is None or not self.diag_transform:
            return self.transform
        il, bl, iu, bu = self.transform
        return jnp.diag(il[0]), bl, jnp.diag(iu[0]), bu


# ----------------------------------------------------------------------------
# DP_SPU module analogue
# ----------------------------------------------------------------------------
class DPSPU:
    def __init__(self, n_features: int, key):
        k1, k2, k3 = jax.random.split(key, 3)
        # torch.normal(zeros(N), ones(N)) -> standard normal, deterministic here
        self.p_uul0 = jax.random.normal(k1, (n_features,), jnp.float32)
        self.p_llg0 = jax.random.normal(k2, (n_features,), jnp.float32)
        self.p_cb = jax.random.normal(k3, (n_features,), jnp.float32)

    def forward(self, in_shape: DPShape) -> DPShape:
        # Fused path: in_shape is an affine transform whose parent is the root
        # box (Linear -> SPU), the case the original network code exercises.
        # TODO(synk): general multi-level back-substitution chain (while-loop
        # over parents) and pre-resolved-bounds inputs are not implemented.
        assert in_shape.transform is not None and not in_shape.diag_transform
        assert in_shape.parent is not None and in_shape.parent.transform is None
        ineql, biasl, inequ, biasu = in_shape.transform
        root = in_shape.parent
        lb, ub, il, bl, iu, bu = dp_spu_fused(
            root.lbounds, root.ubounds, ineql, biasl, inequ, biasu,
            self.p_uul0, self.p_llg0, self.p_cb)
        # Same side effect as in_shape.backsub() in the original module.
        in_shape._lbounds, in_shape._ubounds = lb, ub
        # Keep the SPU transform's diagonal as a (1, N) vector (no torch.diag).
        return DPShape.from_transform(in_shape, il, bl, iu, bu, diag=True)


# ----------------------------------------------------------------------------
# Pure-JAX reference (faithful port of the torch math: pos/neg split, exact /).
# ----------------------------------------------------------------------------
def _reference(root_lb, root_ub, Wl, bl_, Wu, bu_, p_uul0, p_llg0, p_cb):
    def spu(x):
        return jnp.where(x >= 0.0, x * x - 0.5, jax.nn.sigmoid(-x) - 1.0)

    def spu_slope(x):
        s = jax.nn.sigmoid(-x)
        return jnp.where(x < 0.0, -s * (1.0 - s), 2.0 * x)

    def spu_intercept(x):
        return spu(x) - spu_slope(x) * x

    Wl_pos = jnp.where(Wl > 0, Wl, 0.0)
    Wl_neg = jnp.where(Wl < 0, Wl, 0.0)
    Wu_pos = jnp.where(Wu > 0, Wu, 0.0)
    Wu_neg = jnp.where(Wu < 0, Wu, 0.0)
    lb = root_lb @ Wl_pos.T + root_ub @ Wl_neg.T + bl_
    ub = root_ub @ Wu_pos.T + root_lb @ Wu_neg.T + bu_

    lu_slope = (spu(ub) - spu(lb)) / (ub - lb + 1e-6)
    lu_icpt = spu(ub) - lu_slope * ub
    inequ = jnp.zeros_like(lb)
    biasu = jnp.full_like(lb, -0.5)
    ineql = jnp.zeros_like(lb)
    biasl = jnp.maximum(spu(lb), spu(ub))
    below = ub < 0.0
    pub = jax.nn.sigmoid(p_uul0) * (ub - lb) + lb
    inequ = jnp.where(below, spu_slope(pub), inequ)
    biasu = jnp.where(below, spu_intercept(pub), biasu)
    ineql = jnp.where(below, lu_slope, ineql)
    biasl = jnp.where(below, lu_icpt, biasl)
    above = lb > 0.0
    pla = jax.nn.sigmoid(p_llg0) * (ub - lb) + lb
    inequ = jnp.where(above, lu_slope, inequ)
    biasu = jnp.where(above, lu_icpt, biasu)
    ineql = jnp.where(above, spu_slope(pla), ineql)
    biasl = jnp.where(above, spu_intercept(pla), biasl)
    crossing = jnp.logical_and(~below, ~above)
    chord = (spu(lb) + 0.5) / (lb + 1e-6)
    slopecb = jax.nn.sigmoid(p_cb) * (jnp.maximum(spu_slope(pub), 0.0) - chord) + chord
    inequ = jnp.where(crossing, lu_slope, inequ)
    biasu = jnp.where(crossing, lu_icpt, biasu)
    ineql = jnp.where(crossing, slopecb, ineql)
    biasl = jnp.where(crossing,
                      jnp.where(slopecb < 0.0, jnp.full_like(lb, -0.5),
                                -slopecb ** 2 / 4 - 0.5),
                      biasl)
    valley = spu_slope(lb) > lu_slope
    cv = jnp.logical_and(crossing, valley)
    inequ = jnp.where(cv, spu_slope(lb), inequ)
    biasu = jnp.where(cv, spu_intercept(lb), biasu)
    return lb, ub, ineql, biasl, inequ, biasu


# ----------------------------------------------------------------------------
if __name__ == "__main__":
    key = jax.random.PRNGKey(0)
    k_x, k_w, k_b, k_spu = jax.random.split(key, 4)

    D = 16     # input features (root box dimension)
    N = 200    # previous Linear out_features -> SPU width (ragged on purpose:
               # exercises the pad-to-tile path and a 2-step grid)
    eps = 0.1

    # Root abstract element: epsilon-box around a clamped input in [0, 1].
    x = jax.random.uniform(k_x, (1, D), jnp.float32)
    root = DPShape.from_eps(x, eps, (0.0, 1.0))

    # Previous affine layer (torch.nn.Linear-like): W [N, D], b [1, N].
    W = jax.random.normal(k_w, (N, D), jnp.float32) * 0.3
    b = jax.random.normal(k_b, (1, N), jnp.float32) * 0.1
    lin_shape = DPShape.from_transform(root, W, b, W, b)

    # DP_SPU layer (fused resolve + relaxation kernel).
    dp_spu = DPSPU(N, k_spu)
    out_shape = dp_spu.forward(lin_shape)

    ineql_v, biasl, inequ_v, biasu = out_shape.transform
    lb, ub = lin_shape.lbounds, lin_shape.ubounds
    jax.block_until_ready((lb, ub, ineql_v, biasl, inequ_v, biasu))

    # Sanity check against the pure-JAX reference.
    r_lb, r_ub, r_il, r_bl, r_iu, r_bu = _reference(
        root.lbounds, root.ubounds, W, b, W, b,
        dp_spu.p_uul0, dp_spu.p_llg0, dp_spu.p_cb)
    for name, got, want in (("lb", lb, r_lb), ("ub", ub, r_ub),
                            ("ineql", ineql_v, r_il), ("biasl", biasl, r_bl),
                            ("inequ", inequ_v, r_iu), ("biasu", biasu, r_bu)):
        assert got.shape == want.shape, (name, got.shape, want.shape)
        assert jnp.allclose(got, want, rtol=2e-3, atol=2e-3), (
            name, jnp.max(jnp.abs(got - want)))

    print("KERNEL_OK")
</pallas_src>

<mosaic_0001>
module attributes {stable_mosaic.version = 11 : i64} {
  func.func @_fused_dp_spu_kernel(%arg0: i32, %arg1: memref<2x16xf32, #tpu.memory_space<vmem>>, %arg2: memref<128x16xf32, #tpu.memory_space<vmem>>, %arg3: memref<128x16xf32, #tpu.memory_space<vmem>>, %arg4: memref<5x128xf32, #tpu.memory_space<vmem>>, %arg5: memref<6x128xf32, #tpu.memory_space<vmem>>) attributes {dimension_semantics = [#tpu.dimension_semantics<parallel>], iteration_bounds = array<i64: 2>, scalar_prefetch = 0 : i64, scratch_operands = 0 : i64, tpu.core_type = #tpu.core_type<tc>, window_params = [{pipeline_mode = #tpu.pipeline_mode<synchronous>, transform_indices = @transform_0, window_bounds = array<i64: 2, 16>}, {transform_indices = @transform_1, window_bounds = array<i64: 128, 16>}, {transform_indices = @transform_2, window_bounds = array<i64: 128, 16>}, {transform_indices = @transform_3, window_bounds = array<i64: 5, 128>}, {transform_indices = @transform_4, window_bounds = array<i64: 6, 128>}]} {
    %c0 = arith.constant 0 : index
    %c0_0 = arith.constant 0 : index
    %0 = vector.load %arg1[%c0, %c0_0] : memref<2x16xf32, #tpu.memory_space<vmem>>, vector<1x16xf32>
    %c1 = arith.constant 1 : index
    %c0_1 = arith.constant 0 : index
    %1 = vector.load %arg1[%c1, %c0_1] : memref<2x16xf32, #tpu.memory_space<vmem>>, vector<1x16xf32>
    %c0_2 = arith.constant 0 : index
    %c0_3 = arith.constant 0 : index
    %2 = vector.load %arg2[%c0_2, %c0_3] : memref<128x16xf32, #tpu.memory_space<vmem>>, vector<128x16xf32>
    %c0_4 = arith.constant 0 : index
    %c0_5 = arith.constant 0 : index
    %3 = vector.load %arg3[%c0_4, %c0_5] : memref<128x16xf32, #tpu.memory_space<vmem>>, vector<128x16xf32>
    %4 = math.absf %2 : vector<128x16xf32>
    %5 = math.absf %3 : vector<128x16xf32>
    %c0_6 = arith.constant 0 : index
    %c0_7 = arith.constant 0 : index
    %6 = vector.load %arg4[%c0_6, %c0_7] : memref<5x128xf32, #tpu.memory_space<vmem>>, vector<1x128xf32>
    %c1_8 = arith.constant 1 : index
    %c0_9 = arith.constant 0 : index
    %7 = vector.load %arg4[%c1_8, %c0_9] : memref<5x128xf32, #tpu.memory_space<vmem>>, vector<1x128xf32>
    %c2 = arith.constant 2 : index
    %c0_10 = arith.constant 0 : index
    %8 = vector.load %arg4[%c2, %c0_10] : memref<5x128xf32, #tpu.memory_space<vmem>>, vector<1x128xf32>
    %c3 = arith.constant 3 : index
    %c0_11 = arith.constant 0 : index
    %9 = vector.load %arg4[%c3, %c0_11] : memref<5x128xf32, #tpu.memory_space<vmem>>, vector<1x128xf32>
    %c4 = arith.constant 4 : index
    %c0_12 = arith.constant 0 : index
    %10 = vector.load %arg4[%c4, %c0_12] : memref<5x128xf32, #tpu.memory_space<vmem>>, vector<1x128xf32>
    %cst = arith.constant dense<0.000000e+00> : vector<1x128xf32>
    %11 = tpu.matmul %0, %2, %cst {dimension_numbers = #tpu.dot_dimension_numbers<[1], [1], [0], [0], [0, 0, 1, 0], [], []>} : vector<1x16xf32>, vector<128x16xf32>, vector<1x128xf32> -> vector<1x128xf32>
    %cst_13 = arith.constant dense<0.000000e+00> : vector<1x128xf32>
    %12 = tpu.matmul %1, %4, %cst_13 {dimension_numbers = #tpu.dot_dimension_numbers<[1], [1], [0], [0], [0, 0, 1, 0], [], []>} : vector<1x16xf32>, vector<128x16xf32>, vector<1x128xf32> -> vector<1x128xf32>
    %13 = arith.subf %11, %12 : vector<1x128xf32>
    %14 = arith.addf %13, %6 : vector<1x128xf32>
    %cst_14 = arith.constant dense<0.000000e+00> : vector<1x128xf32>
    %15 = tpu.matmul %0, %3, %cst_14 {dimension_numbers = #tpu.dot_dimension_numbers<[1], [1], [0], [0], [0, 0, 1, 0], [], []>} : vector<1x16xf32>, vector<128x16xf32>, vector<1x128xf32> -> vector<1x128xf32>
    %cst_15 = arith.constant dense<0.000000e+00> : vector<1x128xf32>
    %16 = tpu.matmul %1, %5, %cst_15 {dimension_numbers = #tpu.dot_dimension_numbers<[1], [1], [0], [0], [0, 0, 1, 0], [], []>} : vector<1x16xf32>, vector<128x16xf32>, vector<1x128xf32> -> vector<1x128xf32>
    %17 = arith.addf %15, %16 : vector<1x128xf32>
    %18 = arith.addf %17, %7 : vector<1x128xf32>
    %cst_16 = arith.constant 0.000000e+00 : f32
    %19 = vector.broadcast %cst_16 : f32 to vector<1x128xf32>
    %20 = arith.subf %19, %14 : vector<1x128xf32>
    %21 = arith.negf %20 : vector<1x128xf32>
    %22 = math.exp %21 : vector<1x128xf32>
    %cst_17 = arith.constant 1.000000e+00 : f32
    %23 = vector.broadcast %cst_17 : f32 to vector<1x128xf32>
    %24 = arith.addf %23, %22 : vector<1x128xf32>
    %25 = arith.divf %23, %24 : vector<1x128xf32>
    %cst_18 = arith.constant 0.000000e+00 : f32
    %26 = vector.broadcast %cst_18 : f32 to vector<1x128xf32>
    %27 = arith.cmpf oge, %14, %26 : vector<1x128xf32>
    %28 = arith.mulf %14, %14 : vector<1x128xf32>
    %cst_19 = arith.constant 5.000000e-01 : f32
    %29 = vector.broadcast %cst_19 : f32 to vector<1x128xf32>
    %30 = arith.subf %28, %29 : vector<1x128xf32>
    %cst_20 = arith.constant 1.000000e+00 : f32
    %31 = vector.broadcast %cst_20 : f32 to vector<1x128xf32>
    %32 = arith.subf %25, %31 : vector<1x128xf32>
    %33 = arith.select %27, %30, %32 : vector<1x128xi1>, vector<1x128xf32>
    %cst_21 = arith.constant 0.000000e+00 : f32
    %34 = vector.broadcast %cst_21 : f32 to vector<1x128xf32>
    %35 = arith.cmpf olt, %14, %34 : vector<1x128xf32>
    %cst_22 = arith.constant 0.000000e+00 : f32
    %36 = vector.broadcast %cst_22 : f32 to vector<1x128xf32>
    %37 = arith.subf %36, %25 : vector<1x128xf32>
    %cst_23 = arith.constant 1.000000e+00 : f32
    %38 = vector.broadcast %cst_23 : f32 to vector<1x128xf32>
    %39 = arith.subf %38, %25 : vector<1x128xf32>
    %40 = arith.mulf %37, %39 : vector<1x128xf32>
    %cst_24 = arith.constant 2.000000e+00 : f32
    %41 = vector.broadcast %cst_24 : f32 to vector<1x128xf32>
    %42 = arith.mulf %41, %14 : vector<1x128xf32>
    %43 = arith.select %35, %40, %42 : vector<1x128xi1>, vector<1x128xf32>
    %44 = arith.mulf %43, %14 : vector<1x128xf32>
    %45 = arith.subf %33, %44 : vector<1x128xf32>
    %cst_25 = arith.constant 0.000000e+00 : f32
    %46 = vector.broadcast %cst_25 : f32 to vector<1x128xf32>
    %47 = arith.subf %46, %18 : vector<1x128xf32>
    %48 = arith.negf %47 : vector<1x128xf32>
    %49 = math.exp %48 : vector<1x128xf32>
    %cst_26 = arith.constant 1.000000e+00 : f32
    %50 = vector.broadcast %cst_26 : f32 to vector<1x128xf32>
    %51 = arith.addf %50, %49 : vector<1x128xf32>
    %52 = arith.divf %50, %51 : vector<1x128xf32>
    %cst_27 = arith.constant 0.000000e+00 : f32
    %53 = vector.broadcast %cst_27 : f32 to vector<1x128xf32>
    %54 = arith.cmpf oge, %18, %53 : vector<1x128xf32>
    %55 = arith.mulf %18, %18 : vector<1x128xf32>
    %cst_28 = arith.constant 5.000000e-01 : f32
    %56 = vector.broadcast %cst_28 : f32 to vector<1x128xf32>
    %57 = arith.subf %55, %56 : vector<1x128xf32>
    %cst_29 = arith.constant 1.000000e+00 : f32
    %58 = vector.broadcast %cst_29 : f32 to vector<1x128xf32>
    %59 = arith.subf %52, %58 : vector<1x128xf32>
    %60 = arith.select %54, %57, %59 : vector<1x128xi1>, vector<1x128xf32>
    %61 = arith.subf %18, %14 : vector<1x128xf32>
    %62 = arith.mulf %8, %61 : vector<1x128xf32>
    %63 = arith.addf %62, %14 : vector<1x128xf32>
    %64 = arith.mulf %9, %61 : vector<1x128xf32>
    %65 = arith.addf %64, %14 : vector<1x128xf32>
    %cst_30 = arith.constant 0.000000e+00 : f32
    %66 = vector.broadcast %cst_30 : f32 to vector<1x128xf32>
    %67 = arith.subf %66, %63 : vector<1x128xf32>
    %68 = arith.negf %67 : vector<1x128xf32>
    %69 = math.exp %68 : vector<1x128xf32>
    %cst_31 = arith.constant 1.000000e+00 : f32
    %70 = vector.broadcast %cst_31 : f32 to vector<1x128xf32>
    %71 = arith.addf %70, %69 : vector<1x128xf32>
    %72 = arith.divf %70, %71 : vector<1x128xf32>
    %cst_32 = arith.constant 0.000000e+00 : f32
    %73 = vector.broadcast %cst_32 : f32 to vector<1x128xf32>
    %74 = arith.cmpf oge, %63, %73 : vector<1x128xf32>
    %75 = arith.mulf %63, %63 : vector<1x128xf32>
    %cst_33 = arith.constant 5.000000e-01 : f32
    %76 = vector.broadcast %cst_33 : f32 to vector<1x128xf32>
    %77 = arith.subf %75, %76 : vector<1x128xf32>
    %cst_34 = arith.constant 1.000000e+00 : f32
    %78 = vector.broadcast %cst_34 : f32 to vector<1x128xf32>
    %79 = arith.subf %72, %78 : vector<1x128xf32>
    %80 = arith.select %74, %77, %79 : vector<1x128xi1>, vector<1x128xf32>
    %cst_35 = arith.constant 0.000000e+00 : f32
    %81 = vector.broadcast %cst_35 : f32 to vector<1x128xf32>
    %82 = arith.cmpf olt, %63, %81 : vector<1x128xf32>
    %cst_36 = arith.constant 0.000000e+00 : f32
    %83 = vector.broadcast %cst_36 : f32 to vector<1x128xf32>
    %84 = arith.subf %83, %72 : vector<1x128xf32>
    %cst_37 = arith.constant 1.000000e+00 : f32
    %85 = vector.broadcast %cst_37 : f32 to vector<1x128xf32>
    %86 = arith.subf %85, %72 : vector<1x128xf32>
    %87 = arith.mulf %84, %86 : vector<1x128xf32>
    %cst_38 = arith.constant 2.000000e+00 : f32
    %88 = vector.broadcast %cst_38 : f32 to vector<1x128xf32>
    %89 = arith.mulf %88, %63 : vector<1x128xf32>
    %90 = arith.select %82, %87, %89 : vector<1x128xi1>, vector<1x128xf32>
    %91 = arith.mulf %90, %63 : vector<1x128xf32>
    %92 = arith.subf %80, %91 : vector<1x128xf32>
    %cst_39 = arith.constant 0.000000e+00 : f32
    %93 = vector.broadcast %cst_39 : f32 to vector<1x128xf32>
    %94 = arith.subf %93, %65 : vector<1x128xf32>
    %95 = arith.negf %94 : vector<1x128xf32>
    %96 = math.exp %95 : vector<1x128xf32>
    %cst_40 = arith.constant 1.000000e+00 : f32
    %97 = vector.broadcast %cst_40 : f32 to vector<1x128xf32>
    %98 = arith.addf %97, %96 : vector<1x128xf32>
    %99 = arith.divf %97, %98 : vector<1x128xf32>
    %cst_41 = arith.constant 0.000000e+00 : f32
    %100 = vector.broadcast %cst_41 : f32 to vector<1x128xf32>
    %101 = arith.cmpf oge, %65, %100 : vector<1x128xf32>
    %102 = arith.mulf %65, %65 : vector<1x128xf32>
    %cst_42 = arith.constant 5.000000e-01 : f32
    %103 = vector.broadcast %cst_42 : f32 to vector<1x128xf32>
    %104 = arith.subf %102, %103 : vector<1x128xf32>
    %cst_43 = arith.constant 1.000000e+00 : f32
    %105 = vector.broadcast %cst_43 : f32 to vector<1x128xf32>
    %106 = arith.subf %99, %105 : vector<1x128xf32>
    %107 = arith.select %101, %104, %106 : vector<1x128xi1>, vector<1x128xf32>
    %cst_44 = arith.constant 0.000000e+00 : f32
    %108 = vector.broadcast %cst_44 : f32 to vector<1x128xf32>
    %109 = arith.cmpf olt, %65, %108 : vector<1x128xf32>
    %cst_45 = arith.constant 0.000000e+00 : f32
    %110 = vector.broadcast %cst_45 : f32 to vector<1x128xf32>
    %111 = arith.subf %110, %99 : vector<1x128xf32>
    %cst_46 = arith.constant 1.000000e+00 : f32
    %112 = vector.broadcast %cst_46 : f32 to vector<1x128xf32>
    %113 = arith.subf %112, %99 : vector<1x128xf32>
    %114 = arith.mulf %111, %113 : vector<1x128xf32>
    %cst_47 = arith.constant 2.000000e+00 : f32
    %115 = vector.broadcast %cst_47 : f32 to vector<1x128xf32>
    %116 = arith.mulf %115, %65 : vector<1x128xf32>
    %117 = arith.select %109, %114, %116 : vector<1x128xi1>, vector<1x128xf32>
    %118 = arith.mulf %117, %65 : vector<1x128xf32>
    %119 = arith.subf %107, %118 : vector<1x128xf32>
    %120 = arith.subf %60, %33 : vector<1x128xf32>
    %cst_48 = arith.constant 9.99999997E-7 : f32
    %121 = vector.broadcast %cst_48 : f32 to vector<1x128xf32>
    %122 = arith.addf %61, %121 : vector<1x128xf32>
    %123 = arith.divf %120, %122 : vector<1x128xf32>
    %124 = arith.mulf %123, %18 : vector<1x128xf32>
    %125 = arith.subf %60, %124 : vector<1x128xf32>
    %cst_49 = arith.constant 0.000000e+00 : f32
    %126 = vector.broadcast %cst_49 : f32 to vector<1x128xf32>
    %cst_50 = arith.constant -5.000000e-01 : f32
    %127 = vector.broadcast %cst_50 : f32 to vector<1x128xf32>
    %cst_51 = arith.constant 0.000000e+00 : f32
    %128 = vector.broadcast %cst_51 : f32 to vector<1x128xf32>
    %129 = arith.maximumf %33, %60 : vector<1x128xf32>
    %cst_52 = arith.constant 0.000000e+00 : f32
    %130 = vector.broadcast %cst_52 : f32 to vector<1x128xf32>
    %131 = arith.cmpf olt, %18, %130 : vector<1x128xf32>
    %132 = arith.select %131, %90, %126 : vector<1x128xi1>, vector<1x128xf32>
    %133 = arith.select %131, %92, %127 : vector<1x128xi1>, vector<1x128xf32>
    %134 = arith.select %131, %123, %128 : vector<1x128xi1>, vector<1x128xf32>
    %135 = arith.select %131, %125, %129 : vector<1x128xi1>, vector<1x128xf32>
    %cst_53 = arith.constant 0.000000e+00 : f32
    %136 = vector.broadcast %cst_53 : f32 to vector<1x128xf32>
    %137 = arith.cmpf ogt, %14, %136 : vector<1x128xf32>
    %138 = arith.select %137, %123, %132 : vector<1x128xi1>, vector<1x128xf32>
    %139 = arith.select %137, %125, %133 : vector<1x128xi1>, vector<1x128xf32>
    %140 = arith.select %137, %117, %134 : vector<1x128xi1>, vector<1x128xf32>
    %141 = arith.select %137, %119, %135 : vector<1x128xi1>, vector<1x128xf32>
    %cst_54 = arith.constant dense<true> : vector<1x128xi1>
    %142 = arith.xori %131, %cst_54 : vector<1x128xi1>
    %cst_55 = arith.constant dense<true> : vector<1x128xi1>
    %143 = arith.xori %137, %cst_55 : vector<1x128xi1>
    %144 = arith.andi %142, %143 : vector<1x128xi1>
    %cst_56 = arith.constant 5.000000e-01 : f32
    %145 = vector.broadcast %cst_56 : f32 to vector<1x128xf32>
    %146 = arith.addf %33, %145 : vector<1x128xf32>
    %cst_57 = arith.constant 9.99999997E-7 : f32
    %147 = vector.broadcast %cst_57 : f32 to vector<1x128xf32>
    %148 = arith.addf %14, %147 : vector<1x128xf32>
    %149 = arith.divf %146, %148 : vector<1x128xf32>
    %cst_58 = arith.constant 0.000000e+00 : f32
    %150 = vector.broadcast %cst_58 : f32 to vector<1x128xf32>
    %151 = arith.maximumf %90, %150 : vector<1x128xf32>
    %152 = arith.subf %151, %149 : vector<1x128xf32>
    %153 = arith.mulf %10, %152 : vector<1x128xf32>
    %154 = arith.addf %153, %149 : vector<1x128xf32>
    %155 = arith.select %144, %123, %138 : vector<1x128xi1>, vector<1x128xf32>
    %156 = arith.select %144, %125, %139 : vector<1x128xi1>, vector<1x128xf32>
    %157 = arith.select %144, %154, %140 : vector<1x128xi1>, vector<1x128xf32>
    %cst_59 = arith.constant 0.000000e+00 : f32
    %158 = vector.broadcast %cst_59 : f32 to vector<1x128xf32>
    %159 = arith.cmpf olt, %154, %158 : vector<1x128xf32>
    %cst_60 = arith.constant -5.000000e-01 : f32
    %160 = vector.broadcast %cst_60 : f32 to vector<1x128xf32>
    %cst_61 = arith.constant 0.000000e+00 : f32
    %161 = vector.broadcast %cst_61 : f32 to vector<1x128xf32>
    %162 = arith.subf %161, %154 : vector<1x128xf32>
    %163 = arith.mulf %162, %154 : vector<1x128xf32>
    %cst_62 = arith.constant 2.500000e-01 : f32
    %164 = vector.broadcast %cst_62 : f32 to vector<1x128xf32>
    %165 = arith.mulf %163, %164 : vector<1x128xf32>
    %cst_63 = arith.constant 5.000000e-01 : f32
    %166 = vector.broadcast %cst_63 : f32 to vector<1x128xf32>
    %167 = arith.subf %165, %166 : vector<1x128xf32>
    %168 = arith.select %159, %160, %167 : vector<1x128xi1>, vector<1x128xf32>
    %169 = arith.select %144, %168, %141 : vector<1x128xi1>, vector<1x128xf32>
    %170 = arith.cmpf ogt, %43, %123 : vector<1x128xf32>
    %171 = arith.andi %144, %170 : vector<1x128xi1>
    %172 = arith.select %171, %43, %155 : vector<1x128xi1>, vector<1x128xf32>
    %173 = arith.select %171, %45, %156 : vector<1x128xi1>, vector<1x128xf32>
    %c0_64 = arith.constant 0 : index
    %c0_65 = arith.constant 0 : index
    %174 = vector.load %arg5[%c0_64, %c0_65] : memref<6x128xf32, #tpu.memory_space<vmem>>, vector<1x128xf32>
    tpu.vector_store %arg5[%c0_64, %c0_65], %14 {strides = array<i32>} : memref<6x128xf32, #tpu.memory_space<vmem>>, vector<1x128xf32>,
    %c1_66 = arith.constant 1 : index
    %c0_67 = arith.constant 0 : index
    %175 = vector.load %arg5[%c1_66, %c0_67] : memref<6x128xf32, #tpu.memory_space<vmem>>, vector<1x128xf32>
    tpu.vector_store %arg5[%c1_66, %c0_67], %18 {strides = array<i32>} : memref<6x128xf32, #tpu.memory_space<vmem>>, vector<1x128xf32>,
    %c2_68 = arith.constant 2 : index
    %c0_69 = arith.constant 0 : index
    %176 = vector.load %arg5[%c2_68, %c0_69] : memref<6x128xf32, #tpu.memory_space<vmem>>, vector<1x128xf32>
    tpu.vector_store %arg5[%c2_68, %c0_69], %157 {strides = array<i32>} : memref<6x128xf32, #tpu.memory_space<vmem>>, vector<1x128xf32>,
    %c3_70 = arith.constant 3 : index
    %c0_71 = arith.constant 0 : index
    %177 = vector.load %arg5[%c3_70, %c0_71] : memref<6x128xf32, #tpu.memory_space<vmem>>, vector<1x128xf32>
    tpu.vector_store %arg5[%c3_70, %c0_71], %169 {strides = array<i32>} : memref<6x128xf32, #tpu.memory_space<vmem>>, vector<1x128xf32>,
    %c4_72 = arith.constant 4 : index
    %c0_73 = arith.constant 0 : index
    %178 = vector.load %arg5[%c4_72, %c0_73] : memref<6x128xf32, #tpu.memory_space<vmem>>, vector<1x128xf32>
    tpu.vector_store %arg5[%c4_72, %c0_73], %172 {strides = array<i32>} : memref<6x128xf32, #tpu.memory_space<vmem>>, vector<1x128xf32>,
    %c5 = arith.constant 5 : index
    %c0_74 = arith.constant 0 : index
    %179 = vector.load %arg5[%c5, %c0_74] : memref<6x128xf32, #tpu.memory_space<vmem>>, vector<1x128xf32>
    tpu.vector_store %arg5[%c5, %c0_74], %173 {strides = array<i32>} : memref<6x128xf32, #tpu.memory_space<vmem>>, vector<1x128xf32>,
    return
  }
  func.func @transform_0(%arg0: i32) -> (i32, i32) {
    %c0_i32 = arith.constant 0 : i32
    %c0_i32_0 = arith.constant 0 : i32
    %c0_i32_1 = arith.constant 0 : i32
    return %c0_i32, %c0_i32_0 : i32, i32
  }
  func.func @transform_1(%arg0: i32) -> (i32, i32) {
    %c0_i32 = arith.constant 0 : i32
    %c0_i32_0 = arith.constant 0 : i32
    return %arg0, %c0_i32 : i32, i32
  }
  func.func @transform_2(%arg0: i32) -> (i32, i32) {
    %c0_i32 = arith.constant 0 : i32
    %c0_i32_0 = arith.constant 0 : i32
    return %arg0, %c0_i32 : i32, i32
  }
  func.func @transform_3(%arg0: i32) -> (i32, i32) {
    %c0_i32 = arith.constant 0 : i32
    %c0_i32_0 = arith.constant 0 : i32
    return %c0_i32, %arg0 : i32, i32
  }
  func.func @transform_4(%arg0: i32) -> (i32, i32) {
    %c0_i32 = arith.constant 0 : i32
    %c0_i32_0 = arith.constant 0 : i32
    return %c0_i32, %arg0 : i32, i32
  }
}

</mosaic_0001>

<bundles_post_ra>
// kernel: tpu_custom_call.1
= control target key start
LH: loop header
LB: loop body
LE: loop exit
PB: predicated region body
PF: predicated region fallthrough
CT: control target
= control target key end

     0   :  { %9 = vsyncpa [#allocation3], 0  ;;  %s1988_s0 = inlined_call_operand.vmem [shape: f32[2,16], index: 0, kind: input, shape index: {}]   ;;  %s1989_s1 = inlined_call_operand.vmem [shape: f32[256,16], index: 1, kind: input, shape index: {}]   ;;  %s1990_s2 = inlined_call_operand.vmem [shape: f32[256,16], index: 2, kind: input, shape index: {}]   ;;  %s1991_s3 = inlined_call_operand.vmem [shape: f32[5,256], index: 3, kind: input, shape index: {}]   ;;  %s1992_s4 = inlined_call_operand.hbm [shape: f32[6,256], index: 4, kind: output, shape index: {}]  }
   0x1   :  { %11 = vsyncpa [#allocation3 + $0x1], 0  ;;  %s1600_s15 = smov 0   ;;  %s1602_s16 = smov 0  }
   0x2   :  { %s1604_s17 = smov 0   ;;  %s1606_s18 = smov 0  }
   0x3 LB: > { %s1621_s19 = sadd.s32 4294967295, %s1568_s18   ;;  %s1012_s20 = sadd.s32 4294967294, %s1568_s18   ;;  %s1568_s18 = sphi %s1606_s18, %s2002_s18   ;;  %s1564_s17 = sphi %s1604_s17, %s2001_s17   ;;  %s1560_s16 = sphi %s1602_s16, %s2000_s16   ;;  %s1556_s15 = sphi %s1600_s15, %s1999_s15  }
   0x4   : > { %s1625_s21 = sadd.s32 1, %s1568_s18   ;;  %s123_s22 = sadd.s32 1, %s1564_s17 }
   0x5   : > { %s120_s23 = ssub.s32 %s1568_s18, %s1625_s21  ;;  %p133_p0 = scmp.ne.s32.totalorder %s1564_s17, %s1560_s16 }
   0x6   : > { %p121_p1 = scmp.eq.s32.totalorder %s120_s23, 0  ;;  %p134_p2 = scmp.eq.s32.totalorder %s1621_s19, 1 }
   0x7   : > { %p139_p3 = scmp.ne.s32.totalorder %s1560_s16, %s1556_s15  ;;  %p140_p4 = scmp.eq.s32.totalorder %s1012_s20, 1 }
   0x8   : > { %s1636_s24 = scalar_select %p121_p1, %s1564_s17, %s123_s22  }
   0x9   : > { %p1638_p5 = por %p134_p2, %p133_p0  ;;  %p1642_p6 = por %p140_p4, %p139_p3 }
   0xa   : > { %p1015_p7 = scmp.ge.s32.totalorder %s1568_s18, 1  ;;  %p186_p8 = scmp.lt.s32.totalorder %s1568_s18, 3 }
   0xc   : > { %p187_p9 = pnand %p1015_p7, %p186_p8 }
   0xd   : > { %s1017_s27 = sshll.u32 (!%p187_p9), %s1621_s19, 4  ;;  %v1570_v0 = vmov (!%p187_p9), 0.0|0.0   ;;  %vm1571_vm0 = vmmov (!%p187_p9), 0   ;;  %v1572_v1 = vmov (!%p187_p9), 0.0   ;;  %vm308_vm1 = vcmask (!%p187_p9), 130048   ;;  %p233_p11 = scmp.lt.s32.totalorder (!%p187_p9), %s1621_s19, 1 }
   0xe   : > { %190 = sbr.rel (%p187_p9) target bundleno = 443 (0x1bb), region = 36  ;;  %1315 = vmatprep.subr.bf16.mxu0 (!%p187_p9), %v1570_v0  ;;  %p222_p10 = scmp.lt.s32.totalorder (!%p187_p9), %s1017_s27, 31  ;;  %1347 = vmatprep.subr.bf16.mxu1 (!%p187_p9), %v1570_v0  ;;  %vm1669_vm2 = vmpackc.low (!%p187_p9), %vm308_vm1, %vm308_vm1  ;;  %v1747_v55 = vld [vmem:[%s1988_s0] sm:$0x1] (!%p187_p9)  ;;  %v1754_v59 = vld [vmem:[%s1988_s0 + $0x1] sm:$0x1] (!%p187_p9) }
   0xf   : > { %1207 = vmatprep.mubr.msk.f32.mxu0 (!%p187_p9), %vm1571_vm0, %v1572_v1  ;;  %1242 = vmatprep.mubr.msk.f32.mxu1 (!%p187_p9), %vm1571_vm0, %v1572_v1  ;;  %s218_s20 = sand.u32 (!%p187_p9), 1, %s1560_s16   ;;  %vm1573_vm12 = vmmov (!%p187_p9), 1   ;;  %s1104_s30 = sshll.u32 (!%p187_p9), %s1621_s19, 7 }
  0x10   : > { %s1574_s10 = smov (!%p187_p9), [#allocation2]  }
  0x11   : > { %s1510_s11 = sshll.u32 (!%p187_p9), %s1574_s10, 4  ;;  %s1511_s11 = int_to_ptr.vmem [resolvable:$false] %s1510_s11 }
  0x12   : > { %s1512_s12 = scalar_lea.vmem (!%p187_p9), %s1511_s11, 256 }
  0x15   : > { %s2004_s27 = smov (!%p222_p10, %s1017_s27), 31 }
  0x16   : > { %s1018_s28 = sshll.u32 %s2004_s27, 3 }
  0x17   : > { %s1663_s5 = scalar_lea.vmem %s1989_s1, %s1018_s28  ;;  %s1731_s8 = scalar_lea.vmem %s1990_s2, %s1018_s28 }
  0x18   : > { %v239_v2 = vld [vmem:[%s1663_s5] sm:$0xff]  ;;  %v240_v3 = vld [vmem:[%s1663_s5 + $0x8] sm:$0xff]  ;;  %v241_v8 = vld [vmem:[%s1663_s5 + $0x10] sm:$0xff]  ;;  %s234_s13 = scalar_select %p233_p11, %s1621_s19, 1 }
  0x19   : > { %v1316_v5 = vpack.c.bf16 %v240_v3, %v239_v2  ;;  %v271_v6 = vand.u32 2147483647, %v239_v2  ;;  %v272_v7 = vand.u32 2147483647, %v240_v3  ;;  %v242_v9 = vld [vmem:[%s1663_s5 + $0x18] sm:$0xff]  ;;  %v243_v15 = vld [vmem:[%s1663_s5 + $0x20] sm:$0xff] }
  0x1a   : > { %v273_v11 = vand.u32 2147483647, %v241_v8  ;;  %v274_v12 = vand.u32 2147483647, %v242_v9  ;;  %v1320_v13 = vpack.c.bf16 %v242_v9, %v241_v8  ;;  %v244_v16 = vld [vmem:[%s1663_s5 + $0x28] sm:$0xff]  ;;  %v245_v21 = vld [vmem:[%s1663_s5 + $0x30] sm:$0xff] }
  0x1b   : > { %1318 = vmatpush3.bf16.xpose.msk.msra.mxu0 %vm1669_vm2, %v1316_v5  ;;  %v1348_v10 = vpack.c.bf16 %v272_v7, %v271_v6  ;;  %v275_v17 = vand.u32 2147483647, %v243_v15  ;;  %v276_v18 = vand.u32 2147483647, %v244_v16  ;;  %v1324_v19 = vpack.c.bf16 %v244_v16, %v243_v15  ;;  %v246_v22 = vld [vmem:[%s1663_s5 + $0x38] sm:$0xff]  ;;  %v247_v27 = vld [vmem:[%s1663_s5 + $0x40] sm:$0xff] }
  0x1c   : > { %1319 = vmatprep.subr.bf16.mxu0 %v1570_v0  ;;  %v1352_v14 = vpack.c.bf16 %v274_v12, %v273_v11  ;;  %v277_v23 = vand.u32 2147483647, %v245_v21  ;;  %v278_v24 = vand.u32 2147483647, %v246_v22  ;;  %v1328_v25 = vpack.c.bf16 %v246_v22, %v245_v21  ;;  %v248_v28 = vld [vmem:[%s1663_s5 + $0x48] sm:$0xff]  ;;  %v249_v33 = vld [vmem:[%s1663_s5 + $0x50] sm:$0xff] }
  0x1d   : > { %1350 = vmatpush3.bf16.xpose.msk.msra.mxu1 %vm1669_vm2, %v1348_v10  ;;  %v1356_v20 = vpack.c.bf16 %v276_v18, %v275_v17  ;;  %v279_v29 = vand.u32 2147483647, %v247_v27  ;;  %v280_v30 = vand.u32 2147483647, %v248_v28  ;;  %v1332_v31 = vpack.c.bf16 %v248_v28, %v247_v27  ;;  %v250_v34 = vld [vmem:[%s1663_s5 + $0x58] sm:$0xff]  ;;  %v251_v39 = vld [vmem:[%s1663_s5 + $0x60] sm:$0xff] }
  0x1e   : > { %1351 = vmatprep.subr.bf16.mxu1 %v1570_v0  ;;  %v1360_v26 = vpack.c.bf16 %v278_v24, %v277_v23  ;;  %v281_v35 = vand.u32 2147483647, %v249_v33  ;;  %v282_v36 = vand.u32 2147483647, %v250_v34  ;;  %v1336_v37 = vpack.c.bf16 %v250_v34, %v249_v33  ;;  %v252_v40 = vld [vmem:[%s1663_s5 + $0x68] sm:$0xff]  ;;  %v253_v45 = vld [vmem:[%s1663_s5 + $0x70] sm:$0xff] }
  0x1f   : > { %v1364_v32 = vpack.c.bf16 %v280_v30, %v279_v29  ;;  %v283_v41 = vand.u32 2147483647, %v251_v39  ;;  %v284_v42 = vand.u32 2147483647, %v252_v40  ;;  %v1340_v43 = vpack.c.bf16 %v252_v40, %v251_v39  ;;  %v254_v46 = vld [vmem:[%s1663_s5 + $0x78] sm:$0xff]  ;;  %v255_v50 = vld [vmem:[%s1731_s8] sm:$0xff] }
  0x20   : > { %v1368_v38 = vpack.c.bf16 %v282_v36, %v281_v35  ;;  %v285_v47 = vand.u32 2147483647, %v253_v45  ;;  %v286_v48 = vand.u32 2147483647, %v254_v46  ;;  %v1344_v49 = vpack.c.bf16 %v254_v46, %v253_v45  ;;  %v256_v51 = vld [vmem:[%s1731_s8 + $0x8] sm:$0xff]  ;;  %v257_v57 = vld [vmem:[%s1731_s8 + $0x10] sm:$0xff] }
  0x21   : > { %v1372_v44 = vpack.c.bf16 %v284_v42, %v283_v41  ;;  %v287_v53 = vand.u32 2147483647, %v255_v50  ;;  %v288_v54 = vand.u32 2147483647, %v256_v51  ;;  %v258_v58 = vld [vmem:[%s1731_s8 + $0x18] sm:$0xff]  ;;  %v1412_v60 = vpack.c.bf16 %v256_v51, %v255_v50  ;;  %v259_v2 = vld [vmem:[%s1731_s8 + $0x20] sm:$0xff] }
  0x22   : > { %v1376_v52 = vpack.c.bf16 %v286_v48, %v285_v47  ;;  %v289_v61 = vand.u32 2147483647, %v257_v57  ;;  %v290_v62 = vand.u32 2147483647, %v258_v58  ;;  %v260_v3 = vld [vmem:[%s1731_s8 + $0x28] sm:$0xff]  ;;  %v1416_v5 = vpack.c.bf16 %v258_v58, %v257_v57  ;;  %v261_v8 = vld [vmem:[%s1731_s8 + $0x30] sm:$0xff] }
  0x23   : > { %1322 = vmatpush3.bf16.xpose.msk.msra.mxu0 %vm1669_vm2, %v1320_v13  ;;  %v1380_v56 = vpack.c.bf16 %v288_v54, %v287_v53  ;;  %v291_v6 = vand.u32 2147483647, %v259_v2  ;;  %v292_v7 = vand.u32 2147483647, %v260_v3  ;;  %v262_v9 = vld [vmem:[%s1731_s8 + $0x38] sm:$0xff]  ;;  %v1420_v10 = vpack.c.bf16 %v260_v3, %v259_v2  ;;  %v264_v15 = vld [vmem:[%s1731_s8 + $0x48] sm:$0xff] }
  0x24   : > { %1323 = vmatprep.subr.bf16.mxu0 %v1570_v0  ;;  %v1384_v63 = vpack.c.bf16 %v290_v62, %v289_v61  ;;  %v293_v11 = vand.u32 2147483647, %v261_v8  ;;  %v294_v12 = vand.u32 2147483647, %v262_v9  ;;  %v1424_v16 = vpack.c.bf16 %v262_v9, %v261_v8  ;;  %v266_v21 = vld [vmem:[%s1731_s8 + $0x58] sm:$0xff]  ;;  %v268_v27 = vld [vmem:[%s1731_s8 + $0x68] sm:$0xff] }
  0x25   : > { %1354 = vmatpush3.bf16.xpose.msk.msra.mxu1 %vm1669_vm2, %v1352_v14  ;;  %v263_v14 = vld [vmem:[%s1731_s8 + $0x40] sm:$0xff]  ;;  %v296_v18 = vand.u32 2147483647, %v264_v15  ;;  %v298_v24 = vand.u32 2147483647, %v266_v21  ;;  %v270_v33 = vld [vmem:[%s1731_s8 + $0x78] sm:$0xff] }
  0x26   : > { %1355 = vmatprep.subr.bf16.mxu1 %v1570_v0  ;;  %v1392_v13 = vpack.c.bf16 %v294_v12, %v293_v11  ;;  %v295_v17 = vand.u32 2147483647, %v263_v14  ;;  %v1428_v22 = vpack.c.bf16 %v264_v15, %v263_v14  ;;  %v300_v30 = vand.u32 2147483647, %v268_v27  ;;  %s1021_s14 = sshll.u32 %s234_s13, 3  ;;  %s1016_s28 = sshll.u32 %s218_s20, 3 }
  0x27   : > { %v302_v36 = vand.u32 2147483647, %v270_v33  ;;  %s1832_s27 = scalar_lea.vmem %s1991_s3, %s1021_s14  ;;  %s1839_s29 = scalar_lea.vmem [#allocation2], %s1016_s28 }
  0x28   : > { %v303_v39 = vld [vmem:[%s1832_s27] sm:$0x1]  ;;  %v304_v48 = vld [vmem:[%s1832_s27 + $0x1] sm:$0x1]  ;;  %v305_v53 = vld [vmem:[%s1832_s27 + $0x2] sm:$0x1] }
  0x29   : > { %v306_v54 = vld [vmem:[%s1832_s27 + $0x3] sm:$0x1]  ;;  %s929_s5 = sshll.u32 %s1839_s29, 4  ;;  %s916_s19 = scalar_lea.sflag [#allocation3], %s218_s20  ;;  %s1943_s5 = int_to_ptr.vmem [resolvable:$true] %s929_s5 }
  0x2a   : > { %s1506_s9 = scalar_lea.vmem %s1943_s5, 128  ;;  %p1513_p1 = scmp.lt.s32.totalorder %s1943_s5, %s1511_s11 }
  0x2b   : > { %1326 = vmatpush3.bf16.xpose.msk.msra.mxu0 %vm1669_vm2, %v1324_v19  ;;  %v1396_v19 = vpack.c.bf16 %v296_v18, %v295_v17  ;;  %p1507_p12 = scmp.ne.s32.totalorder %s1943_s5, %s1506_s9  ;;  %p1514_p2 = scmp.lt.s32.totalorder %s1512_s12, %s1506_s9 }
  0x2c   : > { %1327 = vmatprep.subr.bf16.mxu0 %v1570_v0 }
  0x2d   : > { %1358 = vmatpush3.bf16.xpose.msk.msra.mxu1 %vm1669_vm2, %v1356_v20  ;;  %v265_v20 = vld [vmem:[%s1731_s8 + $0x50] sm:$0xff]  ;;  %p1508_p13 = pnand %p1507_p12, %p1638_p5  ;;  %p1515_p3 = por %p1514_p2, %p1513_p1 }
  0x2e   : > { %1359 = vmatprep.subr.bf16.mxu1 %v1570_v0  ;;  %v297_v23 = vand.u32 2147483647, %v265_v20  ;;  %v1432_v28 = vpack.c.bf16 %v266_v21, %v265_v20 }
  0x2f   : > { %p1509_p0 = pneg %p1508_p13 }
  0x31   : > { %p1516_p4 = pnand %p1515_p3, %p1509_p0 }
  0x33   : > { %1330 = vmatpush3.bf16.xpose.msk.msra.mxu0 %vm1669_vm2, %v1328_v25  ;;  %v1400_v25 = vpack.c.bf16 %v298_v24, %v297_v23 }
  0x34   : > { %1331 = vmatprep.subr.bf16.mxu0 %v1570_v0 }
  0x35   : > { %1362 = vmatpush3.bf16.xpose.msk.msra.mxu1 %vm1669_vm2, %v1360_v26  ;;  %v267_v26 = vld [vmem:[%s1731_s8 + $0x60] sm:$0xff] }
  0x36   : > { %1363 = vmatprep.subr.bf16.mxu1 %v1570_v0  ;;  %v299_v29 = vand.u32 2147483647, %v267_v26  ;;  %v1436_v34 = vpack.c.bf16 %v268_v27, %v267_v26 }
  0x3b   : > { %1334 = vmatpush3.bf16.xpose.msk.msra.mxu0 %vm1669_vm2, %v1332_v31  ;;  %v1404_v31 = vpack.c.bf16 %v300_v30, %v299_v29 }
  0x3c   : > { %1335 = vmatprep.subr.bf16.mxu0 %v1570_v0 }
  0x3d   : > { %1366 = vmatpush3.bf16.xpose.msk.msra.mxu1 %vm1669_vm2, %v1364_v32  ;;  %v269_v32 = vld [vmem:[%s1731_s8 + $0x70] sm:$0xff]  ;;  %s1941_s8 = scalar_lea.hbm %s1992_s4, %s1104_s30 }
  0x3e   : > { %1367 = vmatprep.subr.bf16.mxu1 %v1570_v0  ;;  %v301_v35 = vand.u32 2147483647, %v269_v32 }
  0x43   : > { %1338 = vmatpush3.bf16.xpose.msk.msra.mxu0 %vm1669_vm2, %v1336_v37  ;;  %v1408_v37 = vpack.c.bf16 %v302_v36, %v301_v35 }
  0x44   : > { %1339 = vmatprep.subr.bf16.mxu0 %v1570_v0 }
  0x45   : > { %1370 = vmatpush3.bf16.xpose.msk.msra.mxu1 %vm1669_vm2, %v1368_v38  ;;  %v1440_v38 = vpack.c.bf16 %v270_v33, %v269_v32 }
  0x46   : > { %1371 = vmatprep.subr.bf16.mxu1 %v1570_v0 }
  0x4b   : > { %1342 = vmatpush3.bf16.xpose.msk.msra.mxu0 %vm1669_vm2, %v1340_v43 }
  0x4c   : > { %1343 = vmatprep.subr.bf16.mxu0 %v1570_v0 }
  0x4d   : > { %1374 = vmatpush3.bf16.xpose.msk.msra.mxu1 %vm1669_vm2, %v1372_v44 }
  0x4e   : > { %1375 = vmatprep.subr.bf16.mxu1 %v1570_v0 }
  0x53   : > { %1346 = vmatpush3.bf16.xpose.msk.msra.mxu0 %vm1669_vm2, %v1344_v49 }
  0x54   : > { %1379 = vmatprep.subr.bf16.mxu0 %v1570_v0 }
  0x55   : > { %1378 = vmatpush3.bf16.xpose.msk.msra.mxu1 %vm1669_vm2, %v1376_v52 }
  0x56   : > { %1411 = vmatprep.subr.bf16.mxu1 %v1570_v0 }
  0x5a   : > { %1208 = vmatmul.mubr.msk.f32.vlgmr.msra.gmra.mrb[0].mxu0 %vm308_vm1, %v1747_v55 }
  0x5b   : > { %1382 = vmatpush3.bf16.xpose.msk.msra.mxu0 %vm1669_vm2, %v1380_v56  ;;  %1277 = vmatprep.mubr.msk.f32.mxu0 %vm1571_vm0, %v1572_v1 }
  0x5c   : > { %1243 = vmatmul.mubr.msk.f32.vlgmr.msra.gmra.mrb[0].mxu1 %vm308_vm1, %v1754_v59  ;;  %1383 = vmatprep.subr.bf16.mxu0 %v1570_v0 }
  0x5d   : > { %1414 = vmatpush3.bf16.xpose.msk.msra.mxu1 %vm1669_vm2, %v1412_v60  ;;  %1312 = vmatprep.mubr.msk.f32.mxu1 %vm1571_vm0, %v1572_v1  ;;  %v1388_v1 = vpack.c.bf16 %v292_v7, %v291_v6 }
  0x5e   : > { %1415 = vmatprep.subr.bf16.mxu1 %v1570_v0 }
  0x63   : > { %1386 = vmatpush3.bf16.xpose.msk.msra.mxu0 %vm1669_vm2, %v1384_v63 }
  0x64   : > { %1387 = vmatprep.subr.bf16.mxu0 %v1570_v0 }
  0x65   : > { %1418 = vmatpush3.bf16.xpose.msk.msra.mxu1 %vm1669_vm2, %v1416_v5 }
  0x66   : > { %1419 = vmatprep.subr.bf16.mxu1 %v1570_v0 }
  0x6b   : > { %1390 = vmatpush3.bf16.xpose.msk.msra.mxu0 %vm1669_vm2, %v1388_v1 }
  0x6c   : > { %1391 = vmatprep.subr.bf16.mxu0 %v1570_v0 }
  0x6d   : > { %1422 = vmatpush3.bf16.xpose.msk.msra.mxu1 %vm1669_vm2, %v1420_v10 }
  0x6e   : > { %1423 = vmatprep.subr.bf16.mxu1 %v1570_v0 }
  0x73   : > { %1394 = vmatpush3.bf16.xpose.msk.msra.mxu0 %vm1669_vm2, %v1392_v13 }
  0x74   : > { %1395 = vmatprep.subr.bf16.mxu0 %v1570_v0 }
  0x75   : > { %1426 = vmatpush3.bf16.xpose.msk.msra.mxu1 %vm1669_vm2, %v1424_v16 }
  0x76   : > { %1427 = vmatprep.subr.bf16.mxu1 %v1570_v0 }
  0x7b   : > { %1398 = vmatpush3.bf16.xpose.msk.msra.mxu0 %vm1669_vm2, %v1396_v19 }
  0x7c   : > { %1399 = vmatprep.subr.bf16.mxu0 %v1570_v0 }
  0x7d   : > { %1430 = vmatpush3.bf16.xpose.msk.msra.mxu1 %vm1669_vm2, %v1428_v22 }
  0x7e   : > { %1431 = vmatprep.subr.bf16.mxu1 %v1570_v0 }
  0x83   : > { %1402 = vmatpush3.bf16.xpose.msk.msra.mxu0 %vm1669_vm2, %v1400_v25 }
  0x84   : > { %1403 = vmatprep.subr.bf16.mxu0 %v1570_v0 }
  0x85   : > { %1434 = vmatpush3.bf16.xpose.msk.msra.mxu1 %vm1669_vm2, %v1432_v28 }
  0x86   : > { %1435 = vmatprep.subr.bf16.mxu1 %v1570_v0 }
  0x8b   : > { %1406 = vmatpush3.bf16.xpose.msk.msra.mxu0 %vm1669_vm2, %v1404_v31 }
  0x8c   : > { %1407 = vmatprep.subr.bf16.mxu0 %v1570_v0 }
  0x8d   : > { %1438 = vmatpush3.bf16.xpose.msk.msra.mxu1 %vm1669_vm2, %v1436_v34 }
  0x8e   : > { %1439 = vmatprep.subr.bf16.mxu1 %v1570_v0 }
  0x93   : > { %1410 = vmatpush3.bf16.xpose.msk.msra.mxu0 %vm1669_vm2, %v1408_v37 }
  0x95   : > { %1442 = vmatpush3.bf16.xpose.msk.msra.mxu1 %vm1669_vm2, %v1440_v38 }
  0x9a   : > { %1278 = vmatmul.mubr.msk.f32.vlgmr.msra.gmra.mrb[2].mxu0 %vm308_vm1, %v1754_v59 }
  0x9c   : > { %1313 = vmatmul.mubr.msk.f32.vlgmr.msra.gmra.mrb[2].mxu1 %vm308_vm1, %v1747_v55 }
 0x12d   : > { %v426_v0 = vpop.f32.mrb[0].mxu0 }
 0x12e   : > { %v1209_v4 = vpop.f32.mrb[1].mxu0 }
 0x12f   : > { %v547_v40 = vpop.f32.mrb[0].mxu1 }
 0x130   : > { %v551_v41 = vsub.f32 %v426_v0, %v547_v40  ;;  %v1244_v42 = vpop.f32.mrb[1].mxu1 }
 0x132   : > { %v1837_v43 = vadd.f32 %v551_v41, %v303_v39 }
 0x134   : > { %909 = vst [vmem:[%s1839_s29] sm:$0x1] %v1837_v43  ;;  %v790_v44 = vsub.f32 0.0, %v1837_v43  ;;  %v888_v8 = vadd.f32 1e-06, %v1837_v43  ;;  %v798_v11 = vmul.f32 %v1837_v43, %v1837_v43  ;;  %vm797_vm3 = vcmp.ge.f32.partialorder %v1837_v43, 0.0 }
 0x135   : > { %v806_v24 = vmul.f32 2.0, %v1837_v43  ;;  %vm802_vm4 = vcmp.lt.f32.partialorder %v1837_v43, 0.0  ;;  %vm879_vm6 = vcmp.gt.f32.partialorder %v1837_v43, 0.0 }
 0x136   : > { %v1090_v45 = vmul.f32 -1.442695, %v790_v44  ;;  %v1091_v19 = vadd.f32 -0.5, %v798_v11  ;;  %vm885_vm15 = vmxor %vm879_vm6, %vm1573_vm12 }
 0x138   : > { %1486 = vpow2.f32 %v1090_v45 }
 0x142   : > { %v1487_v57 = vpop.eup %1486 }
 0x143   : > { %v794_v61 = vadd.f32 1.0, %v1487_v57 }
 0x16d   : > { %v667_v46 = vpop.f32.mrb[2].mxu0 }
 0x16e   : > { %v1279_v47 = vpop.f32.mrb[3].mxu0 }
 0x16f   : > { %v785_v49 = vpop.f32.mrb[2].mxu1 }
 0x170   : > { %v786_v50 = vadd.f32 %v785_v49, %v667_v46  ;;  %v1314_v51 = vpop.f32.mrb[3].mxu1 }
 0x172   : > { %v1845_v52 = vadd.f32 %v786_v50, %v304_v48 }
 0x174   : > { %v810_v55 = vsub.f32 0.0, %v1845_v52  ;;  %v822_v56 = vsub.f32 %v1845_v52, %v1837_v43  ;;  %910 = vst [vmem:[%s1839_s29 + $0x1] sm:$0x1] %v1845_v52  ;;  %v818_v20 = vmul.f32 %v1845_v52, %v1845_v52  ;;  %vm817_vm5 = vcmp.ge.f32.partialorder %v1845_v52, 0.0 }
 0x175   : > { %vm874_vm7 = vcmp.lt.f32.partialorder %v1845_v52, 0.0 }
 0x176   : > { %v1093_v58 = vmul.f32 -1.442695, %v810_v55  ;;  %v823_v59 = vmul.f32 %v822_v56, %v305_v53  ;;  %v825_v60 = vmul.f32 %v822_v56, %v306_v54  ;;  %v868_v10 = vadd.f32 1e-06, %v822_v56  ;;  %vm884_vm13 = vmxor %vm874_vm7, %vm1573_vm12 }
 0x177   : > { %v1094_v25 = vadd.f32 -0.5, %v818_v20  ;;  %vm1907_vm0 = vmand %vm884_vm13, %vm885_vm15 }
 0x178   : > { %1488 = vpow2.f32 %v1093_v58  ;;  %v1855_v62 = vadd.f32 %v823_v59, %v1837_v43  ;;  %v1858_v63 = vadd.f32 %v825_v60, %v1837_v43 }
 0x179   : > { %1490 = vrcp.f32 %v794_v61 }
 0x17a   : > { %v827_v2 = vsub.f32 0.0, %v1855_v62  ;;  %v847_v3 = vsub.f32 0.0, %v1858_v63  ;;  %v835_v34 = vmul.f32 %v1855_v62, %v1855_v62  ;;  %vm834_vm8 = vcmp.ge.f32.partialorder %v1855_v62, 0.0 }
 0x17b   : > { %v855_v38 = vmul.f32 %v1858_v63, %v1858_v63  ;;  %vm839_vm9 = vcmp.lt.f32.partialorder %v1855_v62, 0.0  ;;  %v843_v42 = vmul.f32 2.0, %v1855_v62  ;;  %vm854_vm10 = vcmp.ge.f32.partialorder %v1858_v63, 0.0 }
 0x17c   : > { %v1096_v5 = vmul.f32 -1.442695, %v827_v2  ;;  %v1099_v6 = vmul.f32 -1.442695, %v847_v3  ;;  %v1097_v46 = vadd.f32 -0.5, %v835_v34  ;;  %vm859_vm11 = vcmp.lt.f32.partialorder %v1858_v63, 0.0 }
 0x17d   : > { %v1100_v48 = vadd.f32 -0.5, %v855_v38  ;;  %v863_v51 = vmul.f32 2.0, %v1858_v63 }
 0x17e   : > { %1492 = vpow2.f32 %v1096_v5  ;;  %v307_v5 = vld [vmem:[%s1832_s27 + $0x4] sm:$0x1] }
 0x17f   : > { %1494 = vpow2.f32 %v1099_v6 }
 0x182   : > { %v1489_v7 = vpop.eup %1488 }
 0x183   : > { %v814_v1 = vadd.f32 1.0, %v1489_v7  ;;  %v1491_v9 = vpop.eup %1490 }
 0x184   : > { %v1092_v14 = vadd.f32 -1.0, %v1491_v9  ;;  %v803_v16 = vsub.f32 0.0, %v1491_v9  ;;  %v804_v17 = vsub.f32 1.0, %v1491_v9 }
 0x185   : > { %1496 = vrcp.f32 %v814_v1 }
 0x186   : > { %1498 = vrcp.f32 %v888_v8  ;;  %v1868_v21 = vsel %vm797_vm3, %v1091_v19, %v1092_v14  ;;  %v805_v22 = vmul.f32 %v804_v17, %v803_v16 }
 0x187   : > { %1500 = vrcp.f32 %v868_v10  ;;  %v887_v27 = vadd.f32 0.5, %v1868_v21 }
 0x188   : > { %v1493_v12 = vpop.eup %1492  ;;  %v807_v28 = vsel %vm802_vm4, %v805_v22, %v806_v24 }
 0x189   : > { %v1495_v13 = vpop.eup %1494  ;;  %v831_v15 = vadd.f32 1.0, %v1493_v12  ;;  %v808_v33 = vmul.f32 %v807_v28, %v1837_v43 }
 0x18a   : > { %v851_v18 = vadd.f32 1.0, %v1495_v13 }
 0x18b   : > { %1502 = vrcp.f32 %v831_v15  ;;  %v809_v13 = vsub.f32 %v1868_v21, %v808_v33 }
 0x18c   : > { %1504 = vrcp.f32 %v851_v18 }
 0x18f   : > { %v1497_v23 = vpop.eup %1496 }
 0x190   : > { %v1095_v26 = vadd.f32 -1.0, %v1497_v23  ;;  %v1499_v29 = vpop.eup %1498 }
 0x191   : > { %v1501_v32 = vpop.eup %1500  ;;  %v890_v35 = vmul.f32 %v1499_v29, %v887_v27 }
 0x192   : > { %v821_v30 = vsel %vm817_vm5, %v1094_v25, %v1095_v26 }
 0x193   : > { %v867_v31 = vsub.f32 %v821_v30, %v1868_v21  ;;  %v873_v1 = vmax.f32 %v1868_v21, %v821_v30 }
 0x195   : > { %v1503_v36 = vpop.eup %1502  ;;  %v870_v37 = vmul.f32 %v1501_v32, %v867_v31 }
 0x196   : > { %v1505_v0 = vpop.eup %1504  ;;  %v1098_v4 = vadd.f32 -1.0, %v1503_v36  ;;  %v840_v39 = vsub.f32 0.0, %v1503_v36  ;;  %v841_v40 = vsub.f32 1.0, %v1503_v36 }
 0x197   : > { %v871_v41 = vmul.f32 %v870_v37, %v1845_v52  ;;  %v860_v44 = vsub.f32 0.0, %v1505_v0  ;;  %v861_v45 = vsub.f32 1.0, %v1505_v0  ;;  %v1101_v49 = vadd.f32 -1.0, %v1505_v0 }
 0x198   : > { %v842_v47 = vmul.f32 %v841_v40, %v840_v39  ;;  %v838_v53 = vsel %vm834_vm8, %v1097_v46, %v1098_v4  ;;  %v877_v55 = vsel %vm874_vm7, %v870_v37, 0.0  ;;  %vm905_vm14 = vcmp.gt.f32.partialorder %v807_v28, %v870_v37 }
 0x199   : > { %v862_v50 = vmul.f32 %v861_v45, %v860_v44  ;;  %v872_v58 = vsub.f32 %v821_v30, %v871_v41  ;;  %v858_v7 = vsel %vm854_vm10, %v1100_v48, %v1101_v49  ;;  %vm906_vm1 = vmand %vm1907_vm0, %vm905_vm14 }
 0x19a   : > { %v844_v54 = vsel %vm839_vm9, %v842_v47, %v843_v42 }
 0x19b   : > { %v845_v56 = vmul.f32 %v844_v54, %v1855_v62  ;;  %v864_v57 = vsel %vm859_vm11, %v862_v50, %v863_v51  ;;  %v875_v59 = vsel %vm874_vm7, %v844_v54, 0.0  ;;  %v891_v62 = vmax.f32 %v844_v54, 0.0 }
 0x19c   : > { %v865_v60 = vmul.f32 %v864_v57, %v1858_v63  ;;  %v880_v61 = vsel %vm879_vm6, %v870_v37, %v875_v59  ;;  %v882_v2 = vsel %vm879_vm6, %v864_v57, %v877_v55  ;;  %v878_v63 = vsel %vm874_vm7, %v872_v58, %v873_v1 }
 0x19d   : > { %v846_v6 = vsub.f32 %v838_v53, %v845_v56  ;;  %v895_v8 = vsel %vm1907_vm0, %v870_v37, %v880_v61  ;;  %v892_v10 = vsub.f32 %v891_v62, %v890_v35 }
 0x19e   : > { %v866_v9 = vsub.f32 %v858_v7, %v865_v60  ;;  %v907_v11 = vsel %vm906_vm1, %v807_v28, %v895_v8 }
 0x19f   : > { %v876_v12 = vsel %vm874_vm7, %v846_v6, -0.5  ;;  %913 = vst [vmem:[%s1839_s29 + $0x4] sm:$0x1] %v907_v11  ;;  %v893_v16 = vmul.f32 %v892_v10, %v307_v5 }
 0x1a0   : > { %v881_v14 = vsel %vm879_vm6, %v872_v58, %v876_v12  ;;  %v883_v15 = vsel %vm879_vm6, %v866_v9, %v878_v63 }
 0x1a1   : > { %v896_v17 = vsel %vm1907_vm0, %v872_v58, %v881_v14  ;;  %v894_v18 = vadd.f32 %v893_v16, %v890_v35 }
 0x1a2   : > { %v908_v19 = vsel %vm906_vm1, %v809_v13, %v896_v17 }
 0x1a3   : > { %914 = vst [vmem:[%s1839_s29 + $0x5] sm:$0x1] %v908_v19  ;;  %v897_v52 = vsel %vm1907_vm0, %v894_v18, %v882_v2  ;;  %v899_v20 = vsub.f32 0.0, %v894_v18  ;;  %vm898_vm2 = vcmp.lt.f32.partialorder %v894_v18, 0.0 }
 0x1a4   : > { %911 = vst [vmem:[%s1839_s29 + $0x2] sm:$0x1] %v897_v52 }
 0x1a5   : > { %v900_v21 = vmul.f32 %v899_v20, %v894_v18 }
 0x1a7   : > { %v901_v22 = vmul.f32 0.25, %v900_v21 }
 0x1a9   : > { %v1102_v43 = vadd.f32 -0.5, %v901_v22 }
 0x1ab   : > { %v903_v23 = vsel %vm898_vm2, -0.5, %v1102_v43 }
 0x1ac   : > { %v904_v24 = vsel %vm1907_vm0, %v903_v23, %v883_v15 }
 0x1ad   : > { %912 = vst [vmem:[%s1839_s29 + $0x3] sm:$0x1] %v904_v24 }
 0x1ae   : > { %1519 = shalt.err (!%p1516_p4)
}
 0x1af   : > { %s1520_s13 = scalar_lea.hbm %s1941_s8, 128  ;;  %s1524_s22 = scalar_lea.hbm %s1992_s4, 256 }
 0x1b0   : > { %p1521_p7 = scmp.ne.s32.totalorder %s1941_s8, %s1520_s13  ;;  %p1525_p10 = scmp.lt.u32.totalorder %s1941_s8, %s1992_s4 }
 0x1b1   : > { %p1526_p11 = scmp.lt.u32.totalorder %s1524_s22, %s1520_s13  ;;  %p1528_p13 = scmp.lt.u32.totalorder %s1520_s13, %s1941_s8 }
 0x1b2   : > { %p1522_p8 = pnand %p1521_p7, %p1638_p5 }
 0x1b3   : > { %p1527_p12 = por %p1526_p11, %p1525_p10 }
 0x1b4   : > { %p1523_p9 = pneg %p1522_p8 }
 0x1b5   : > { %p1529_p0 = por %p1528_p13, %p1527_p12 }
 0x1b7   : > { %p1530_p1 = pnand %p1529_p0, %p1523_p9 }
 0x1b9   : > { %1533 = shalt.err (!%p1530_p1)
}
 0x1ba   : > { %1443 = dma.vmem_to_hbm [thread:$0]  (%p1638_p5), %s1943_s5, 128, %s1941_s8, %s916_s19  }
 0x1bb PF: > { %p1449_p2 = scmp.ge.s32.totalorder %s1568_s18, 2  ;;  %s941_s28 = sand.u32 1, %s1556_s15  }
 0x1bc   : > { %s942_s29 = scalar_lea.sflag [#allocation3], %s941_s28 }
 0x1bd   : > { %p1446_p3 = pnand %p1449_p2, %p1642_p6 }
 0x1bf   : > { %1551 = dma.done.wait (!%p1446_p3), %s942_s29, 128  }
 0x1c0   : > { %1553 = vsyncadd (!%p1446_p3), %s942_s29, 4294967168  ;;  %p14_p4 = scmp.ge.s32.totalorder %s1625_s21, 4   ;;  %s1999_s15 = smov %s1560_s16 }
 0x1c1   : > { %s2000_s16 = smov %s1564_s17  ;;  %s2001_s17 = smov %s1636_s24 }
 0x1c2   : > { %s2002_s18 = smov %s1625_s21  ;;  %16 = sbr.rel (!%p14_p4) target bundleno = 3 (0x3), region = 77 }
 0x1c9   :  { %947 = vsyncpa [#allocation3], 1 }
 0x1ca   :  { %949 = vsyncpa [#allocation3 + $0x1], 1 }

</bundles_post_ra>
